<compile_context>
chip_gen: v6e
topology: v6e:2x2x1
jax: 0.10.0
libtpu: 0.0.40
codegen_flags: <defaults>
</compile_context>

<pallas_src>
import jax
import jax.numpy as jnp
from jax.experimental import pallas as pl
from jax.experimental.pallas import tpu as pltpu


def _round_up(x, m):
    return (x + m - 1) // m * m


def _cdiv(a, b):
    return -(-a // b)


def _matmul_bias_relu_kernel(p_ref, w_ref, b_ref, o_ref):
    # p_ref: (tm, Kp)   bf16 im2col patch rows (K zero-padded to 128)
    # w_ref: (Kp, Cp)   bf16 weight matrix (zero-padded rows/cols)
    # b_ref: (1, Cp)    f32 bias
    # o_ref: (tm, Cp)   bf16 output, lane-dense in Cout
    acc = jnp.dot(p_ref[...], w_ref[...], preferred_element_type=jnp.float32)
    acc = acc + b_ref[...]
    o_ref[...] = jnp.maximum(acc, 0.0).astype(o_ref.dtype)


def _choose_m_tile(M, tile_m):
    """Pick the M-tile height.

    - >= 2 grid steps whenever M is non-trivial (keeps both v7x TensorCores
      busy via dimension_semantics=("parallel",)).
    - 256-row granularity for big tiles (full MXU passes on v6e/v7x),
      16-row granularity otherwise (bf16 sublane packing), and sized to
      avoid a nearly-empty final tile.
    """
    if M <= 16:
        return max(16, _round_up(M, 16))
    num_tiles = max(2, _cdiv(M, tile_m))
    rows = _cdiv(M, num_tiles)
    gran = 256 if rows >= 256 else 16
    return _round_up(rows, gran)


def conv_layer_forward(x_nchw, w_oihw, b, *, tile_m=2048):
    """F.relu(conv2d(x, w, b, stride=1)) with NCHW in/out (PyTorch semantics)."""
    N, Cin, H, W = x_nchw.shape
    Cout, Cin_w, KH, KW = w_oihw.shape
    assert Cin == Cin_w
    Hout, Wout = H - KH + 1, W - KW + 1
    M = N * Hout * Wout
    K = KH * KW * Cin

    Kp = _round_up(K, 128)
    Cp = _round_up(Cout, 128)
    tm = _choose_m_tile(M, tile_m)
    Mp = _round_up(M, tm)

    # ---- wrapper-side im2col, directly in bf16, column order (kh, kw, cin).
    # The K zero-pad is just one more block in the same concat.
    x_nhwc = jnp.transpose(x_nchw, (0, 2, 3, 1)).astype(jnp.bfloat16)
    cols = [x_nhwc[:, kh:kh + Hout, kw:kw + Wout, :]
            for kh in range(KH) for kw in range(KW)]
    if Kp > K:
        cols.append(jnp.zeros((N, Hout, Wout, Kp - K), jnp.bfloat16))
    patches = jnp.concatenate(cols, axis=-1).reshape(M, Kp)
    if Mp > M:
        patches = jnp.pad(patches, ((0, Mp - M), (0, 0)))

    # Matching weight matrix: rows ordered (kh, kw, cin); cast once, pad in bf16.
    w_mat = jnp.transpose(w_oihw, (2, 3, 1, 0)).reshape(K, Cout).astype(jnp.bfloat16)
    w_mat = jnp.pad(w_mat, ((0, Kp - K), (0, Cp - Cout)))
    b_mat = jnp.pad(b.astype(jnp.float32).reshape(1, Cout), ((0, 0), (0, Cp - Cout)))

    cost = pl.CostEstimate(
        flops=2 * M * K * Cout,
        transcendentals=0,
        bytes_accessed=Mp * Kp * 2 + Kp * Cp * 2 + Cp * 4 + Mp * Cp * 2,
    )

    out = pl.pallas_call(
        _matmul_bias_relu_kernel,
        out_shape=jax.ShapeDtypeStruct((Mp, Cp), jnp.bfloat16),
        grid_spec=pltpu.PrefetchScalarGridSpec(
            num_scalar_prefetch=0,
            grid=(Mp // tm,),
            in_specs=[
                pl.BlockSpec((tm, Kp), lambda i: (i, 0)),
                pl.BlockSpec((Kp, Cp), lambda i: (0, 0)),
                pl.BlockSpec((1, Cp), lambda i: (0, 0)),
            ],
            out_specs=pl.BlockSpec((tm, Cp), lambda i: (i, 0)),
        ),
        compiler_params=pltpu.CompilerParams(
            dimension_semantics=("parallel",)),
        cost_estimate=cost,
    )(patches, w_mat, b_mat)

    # (Mp, Cp) bf16 -> (N, Hout, Wout, Cout) -> NCHW, back to input dtype.
    out = out[:M, :Cout].reshape(N, Hout, Wout, Cout)
    return jnp.transpose(out, (0, 3, 1, 2)).astype(x_nchw.dtype)


def _reference(x_nchw, w_oihw, b):
    y = jax.lax.conv_general_dilated(
        x_nchw.astype(jnp.float32), w_oihw.astype(jnp.float32),
        window_strides=(1, 1), padding="VALID",
        dimension_numbers=("NCHW", "OIHW", "NCHW"))
    y = y + b.reshape(1, -1, 1, 1)
    return jnp.maximum(y, 0.0)


if __name__ == "__main__":
    # ConvLayer defaults: in_channels=1, out_channels=256, kernel_size=9, stride=1
    N, CIN, H, W = 2, 1, 16, 16
    COUT, K = 256, 9

    key = jax.random.PRNGKey(0)
    kx, kw, kb = jax.random.split(key, 3)
    x = jax.random.normal(kx, (N, CIN, H, W), dtype=jnp.float32)
    weight = 0.05 * jax.random.normal(kw, (COUT, CIN, K, K), dtype=jnp.float32)
    bias = 0.01 * jax.random.normal(kb, (COUT,), dtype=jnp.float32)

    out = conv_layer_forward(x, weight, bias)
    out = jax.block_until_ready(out)

    ref = jax.block_until_ready(_reference(x, weight, bias))
    assert out.shape == (N, COUT, H - K + 1, W - K + 1)
    # bf16 MXU operands + bf16 output with f32 accumulation -> loosened tolerance.
    assert jnp.allclose(out, ref, atol=2e-2, rtol=2e-2)

    print("KERNEL_OK")
</pallas_src>

<mosaic_0001>
module attributes {stable_mosaic.version = 11 : i64} {
  func.func @_matmul_bias_relu_kernel(%arg0: i32, %arg1: memref<64x128xbf16, #tpu.memory_space<vmem>>, %arg2: memref<128x256xbf16, #tpu.memory_space<vmem>>, %arg3: memref<1x256xf32, #tpu.memory_space<vmem>>, %arg4: memref<64x256xbf16, #tpu.memory_space<vmem>>) attributes {dimension_semantics = [#tpu.dimension_semantics<parallel>], iteration_bounds = array<i64: 2>, scalar_prefetch = 0 : i64, scratch_operands = 0 : i64, tpu.core_type = #tpu.core_type<tc>, window_params = [{transform_indices = @transform_0, window_bounds = array<i64: 64, 128>}, {pipeline_mode = #tpu.pipeline_mode<synchronous>, transform_indices = @transform_1, window_bounds = array<i64: 128, 256>}, {pipeline_mode = #tpu.pipeline_mode<synchronous>, transform_indices = @transform_2, window_bounds = array<i64: 1, 256>}, {transform_indices = @transform_3, window_bounds = array<i64: 64, 256>}]} {
    %c0 = arith.constant 0 : index
    %c0_0 = arith.constant 0 : index
    %0 = vector.load %arg1[%c0, %c0_0] : memref<64x128xbf16, #tpu.memory_space<vmem>>, vector<64x128xbf16>
    %c0_1 = arith.constant 0 : index
    %c0_2 = arith.constant 0 : index
    %1 = vector.load %arg2[%c0_1, %c0_2] : memref<128x256xbf16, #tpu.memory_space<vmem>>, vector<128x256xbf16>
    %cst = arith.constant dense<0.000000e+00> : vector<64x256xf32>
    %2 = tpu.matmul %0, %1, %cst {dimension_numbers = #tpu.dot_dimension_numbers<[1], [0], [0], [1], [0, 0, 1, 1], [], []>} : vector<64x128xbf16>, vector<128x256xbf16>, vector<64x256xf32> -> vector<64x256xf32>
    %c0_3 = arith.constant 0 : index
    %c0_4 = arith.constant 0 : index
    %3 = vector.load %arg3[%c0_3, %c0_4] : memref<1x256xf32, #tpu.memory_space<vmem>>, vector<1x256xf32>
    %4 = vector.broadcast %3 : vector<1x256xf32> to vector<64x256xf32>
    %5 = arith.addf %2, %4 : vector<64x256xf32>
    %cst_5 = arith.constant 0.000000e+00 : f32
    %6 = vector.broadcast %cst_5 : f32 to vector<64x256xf32>
    %7 = arith.maximumf %5, %6 : vector<64x256xf32>
    %8 = arith.truncf %7 : vector<64x256xf32> to vector<64x256xbf16>
    %c0_6 = arith.constant 0 : index
    %c0_7 = arith.constant 0 : index
    %9 = vector.load %arg4[%c0_6, %c0_7] : memref<64x256xbf16, #tpu.memory_space<vmem>>, vector<64x256xbf16>
    tpu.vector_store %arg4[%c0_6, %c0_7], %8 {strides = array<i32>} : memref<64x256xbf16, #tpu.memory_space<vmem>>, vector<64x256xbf16>,
    return
  }
  func.func @transform_0(%arg0: i32) -> (i32, i32) {
    %c0_i32 = arith.constant 0 : i32
    %c0_i32_0 = arith.constant 0 : i32
    return %arg0, %c0_i32 : i32, i32
  }
  func.func @transform_1(%arg0: i32) -> (i32, i32) {
    %c0_i32 = arith.constant 0 : i32
    %c0_i32_0 = arith.constant 0 : i32
    %c0_i32_1 = arith.constant 0 : i32
    return %c0_i32, %c0_i32_0 : i32, i32
  }
  func.func @transform_2(%arg0: i32) -> (i32, i32) {
    %c0_i32 = arith.constant 0 : i32
    %c0_i32_0 = arith.constant 0 : i32
    %c0_i32_1 = arith.constant 0 : i32
    return %c0_i32, %c0_i32_0 : i32, i32
  }
  func.func @transform_3(%arg0: i32) -> (i32, i32) {
    %c0_i32 = arith.constant 0 : i32
    %c0_i32_0 = arith.constant 0 : i32
    return %arg0, %c0_i32 : i32, i32
  }
}

</mosaic_0001>

<bundles_post_ra>
// kernel: tpu_custom_call.1
= control target key start
LH: loop header
LB: loop body
LE: loop exit
PB: predicated region body
PF: predicated region fallthrough
CT: control target
= control target key end

     0   :  { %8 = vsyncpa [#allocation3], 0  ;;  %s1106_s0 = inlined_call_operand.hbm [shape: bf16[128,128], index: 0, kind: input, shape index: {}]   ;;  %s1107_s1 = inlined_call_operand.hbm [shape: bf16[128,256], index: 1, kind: input, shape index: {}]   ;;  %s1108_s2 = inlined_call_operand.vmem [shape: f32[1,256], index: 2, kind: input, shape index: {}]   ;;  %s1109_s3 = inlined_call_operand.hbm [shape: bf16[128,256], index: 3, kind: output, shape index: {}]  }
   0x1   :  { %10 = vsyncpa [#allocation3 + $0x1], 0 }
   0x2   :  { %11 = vsyncpa [#allocation6], 0 }
   0x3   :  { %12 = vsyncpa [#allocation4], 0 }
   0x4   :  { %14 = vsyncpa [#allocation4 + $0x1], 0  ;;  %s908_s12 = smov 0   ;;  %s910_s13 = smov 0  }
   0x5   :  { %s912_s14 = smov 0   ;;  %s914_s15 = smov 0  }
   0x6 LB: > { %s929_s16 = sadd.s32 4294967295, %s876_s15   ;;  %s590_s17 = sadd.s32 4294967294, %s876_s15   ;;  %s876_s15 = sphi %s914_s15, %s1131_s15   ;;  %s872_s14 = sphi %s912_s14, %s1130_s14   ;;  %s868_s13 = sphi %s910_s13, %s1129_s13   ;;  %s864_s12 = sphi %s908_s12, %s1128_s12  }
   0x7   : > { %p40_p0 = scmp.ne.s32.totalorder %s868_s13, %s864_s12  ;;  %p1110_p1 = scmp.eq.s32.totalorder %s929_s16, 0 }
   0x8   : > { %p112_p3 = scmp.eq.s32.totalorder %s590_s17, 1  ;;  %p591_p5 = scmp.ge.s32.totalorder %s876_s15, 1 }
   0x9   : > { %p938_p4 = por %p1110_p1, %p40_p0  ;;  %p119_p7 = scmp.lt.s32.totalorder %s876_s15, 3 }
   0xa   : > { %p943_p6 = por %p112_p3, %p40_p0  ;;  %s878_s21 = smov [#allocation5]  }
   0xb   : > { %s1114_s18 = scalar_select %p938_p4, 1, 0 }
   0xc   : > { %s1115_s19 = scalar_select %p943_p6, 1, 0 }
   0xd   : > { %p948_p8 = pnand %p591_p5, %p119_p7  ;;  %s131_s22 = sshll.u32 %s878_s21, 4  ;;  %s132_s22 = int_to_ptr.vmem [resolvable:$true] %s131_s22 }
   0xe   : > { %s962_s24 = sadd.s32 1, %s876_s15   ;;  %s27_s25 = sadd.s32 1, %s872_s14 }
   0xf   : > { %s1116_s20 = scalar_select %p948_p8, 1, 0 }
  0x10   : > { %p670_p9 = pneg %p948_p8  ;;  %s24_s26 = ssub.s32 %s876_s15, %s962_s24 }
  0x11   : > { %s765_s27 = scalar_lea.vmem %s132_s22, 2048  ;;  %p773_p5 = scmp.lt.s32.totalorder %s132_s22, %s132_s22 }
  0x12   : > { %p957_p11 = pnand %p670_p9, %p1110_p1  ;;  %p766_p13 = scmp.ne.s32.totalorder %s132_s22, %s765_s27 }
  0x13   : > { %p774_p7 = scmp.lt.s32.totalorder %s765_s27, %s765_s27 }
  0x14   : > { %p756_p12 = pneg %p957_p11 }
  0x15   : > { %p775_p10 = por %p774_p7, %p773_p5 }
  0x16   : > { %p768_p0 = pnand %p766_p13, %p756_p12 }
  0x18   : > { %p769_p3 = pneg %p768_p0 }
  0x1a   : > { %p776_p2 = pnand %p775_p10, %p769_p3 }
  0x1c   : > { %779 = shalt.err (!%p776_p2)
}
  0x1d   : > { %s879_s28 = smov 128   ;;  %s880_s29 = smov 8  }
  0x1e   : > { %673 = dma.hbm_to_vmem [thread:$0]  (!%p957_p11), %s1107_s1, 2048, %s132_s22, [#allocation6], %s879_s28, %s879_s28, %s880_s29  }
  0x1f   : > { %p25_p9 = scmp.eq.s32.totalorder %s24_s26, 0  ;;  %p34_p12 = scmp.ne.s32.totalorder %s872_s14, %s868_s13 }
  0x20   : > { %p35_p10 = scmp.eq.s32.totalorder %s876_s15, 0  ;;  %p683_p2 = scmp.lt.s32.totalorder %s876_s15, 2 }
  0x21   : > { %s979_s5 = scalar_select %p25_p9, %s872_s14, %s27_s25  }
  0x22   : > { %p36_p13 = por %p35_p10, %p34_p12  ;;  %p1118_p0 = scmp.eq.s32.totalorder %s929_s16, 1 }
  0x23   : > { %s148_s7 = sand.u32 1, %s872_s14   ;;  %s635_s8 = sshll.u32 %s876_s15, 9 }
  0x24   : > { %p983_p3 = por %p1118_p0, %p34_p12  ;;  %s594_s9 = sshll.u32 %s148_s7, 5 }
  0x25   : > { %s992_s17 = scalar_lea.hbm %s1106_s0, %s635_s8  ;;  %s152_s21 = scalar_lea.vmem [#allocation2], %s594_s9 }
  0x26   : > { %s1119_s6 = scalar_select %p983_p3, 1, 0 }
  0x27   : > { %s159_s22 = sshll.u32 %s152_s21, 4  ;;  %p994_p11 = pnand %p683_p2, %p36_p13  ;;  %s998_s22 = int_to_ptr.vmem [resolvable:$true] %s159_s22 }
  0x28   : > { %s1000_s25 = scalar_lea.sflag [#allocation3], %s148_s7  ;;  %s780_s26 = scalar_lea.hbm %s992_s17, 512 }
  0x29   : > { %p781_p5 = scmp.ne.s32.totalorder %s992_s17, %s780_s26  ;;  %p782_p7 = pneg %p994_p11 }
  0x2a   : > { %s785_s29 = scalar_lea.hbm %s1106_s0, 1024  ;;  %p786_p10 = scmp.lt.s32.totalorder %s992_s17, %s1106_s0 }
  0x2b   : > { %p783_p9 = pnand %p782_p7, %p781_p5  ;;  %p787_p2 = scmp.lt.s32.totalorder %s785_s29, %s780_s26 }
  0x2d   : > { %p784_p12 = pneg %p783_p9  ;;  %p788_p13 = por %p787_p2, %p786_p10 }
  0x2f   : > { %p789_p0 = pnand %p788_p13, %p784_p12 }
  0x31   : > { %792 = shalt.err (!%p789_p0)
}
  0x32   : > { %s793_s7 = scalar_lea.vmem %s998_s22, 512  ;;  %s881_s8 = smov [#allocation2]  }
  0x33   : > { %p794_p1 = scmp.ne.s32.totalorder %s998_s22, %s793_s7  ;;  %s798_s9 = sshll.u32 %s881_s8, 4  ;;  %s799_s9 = int_to_ptr.vmem [resolvable:$false] %s798_s9 }
  0x34   : > { %s800_s10 = scalar_lea.vmem %s799_s9, 1024  ;;  %p801_p9 = scmp.lt.s32.totalorder %s998_s22, %s799_s9 }
  0x35   : > { %p796_p6 = pnand %p794_p1, %p782_p7  ;;  %p802_p3 = scmp.lt.s32.totalorder %s800_s10, %s793_s7 }
  0x37   : > { %p797_p5 = pneg %p796_p6  ;;  %p803_p4 = por %p802_p3, %p801_p9 }
  0x39   : > { %p804_p8 = pnand %p803_p4, %p797_p5 }
  0x3b   : > { %807 = shalt.err (!%p804_p8)
}
  0x3c   : > { %s882_s11 = smov 64   ;;  %s883_s21 = smov 4  }
  0x3d   : > { %677 = dma.hbm_to_vmem [thread:$0]  (!%p994_p11), %s992_s17, 512, %s998_s22, %s1000_s25, %s882_s11, %s882_s11, %s883_s21  }
  0x3e   : > { %p1121_p1 = scmp.ne.s32.totalorder %s1116_s20, 0 }
  0x3f   : > { %s1024_s26 = sand.u32 (!%p1121_p1), 1, %s868_s13   ;;  %p1122_p4 = scmp.ne.s32.totalorder (!%p1121_p1), %s1114_s18, 0 }
  0x40   : > { %171 = sbr.rel (%p1121_p1) target bundleno = 334 (0x14e), region = 32  ;;  %s598_s27 = sshll.u32 (!%p1121_p1), %s1024_s26, 5 }
  0x41   : > { %s174_s28 = scalar_lea.sflag (!%p1121_p1), [#allocation3], %s1024_s26  ;;  %s1028_s29 = scalar_lea.vmem (!%p1121_p1), [#allocation2], %s598_s27 }
  0x45   : > { %851 = dma.done.wait (%p1122_p4), %s174_s28, 512  }
  0x46   : > { %853 = vsyncadd (%p1122_p4), %s174_s28, 4294966784  ;;  %p1123_p6 = scmp.eq.s32.totalorder %s929_s16, 0 }
  0x48   : > { %855 = dma.done.wait (%p1123_p6), [#allocation6], 2048   ;;  %p1124_p8 = pmov %p1123_p6 }
  0x49   : > { %v884_v0 = vmov 0   ;;  %v726_v1 = vld [vmem:[#allocation5 + $0x74] ss:$8 sps:$4 sm:$0xff]   ;;  %v728_v2 = vld [vmem:[#allocation5 + $0x70] ss:$8 sps:$4 sm:$0xff]   ;;  %v750_v17 = vld [vmem:[%s1028_s29] sm:$0xff]   ;;  %v233_v21 = vlaneseq }
  0x4a   : > { %857 = vsyncadd (%p1124_p8), [#allocation6], 4294965248  ;;  %379 = vmatprep.mubr.bf16.mxu0 %v884_v0  ;;  %399 = vmatprep.mubr.bf16.mxu1 %v884_v0  ;;  %v729_v3 = vld [vmem:[#allocation5 + $0x64] ss:$8 sps:$4 sm:$0xff]   ;;  %v731_v4 = vld [vmem:[#allocation5 + $0x60] ss:$8 sps:$4 sm:$0xff]  }
  0x4b   : > { %347 = vmatprep.subr.bf16.mxu0 %v726_v1  ;;  %646 = vmatprep.subr.bf16.mxu1 %v726_v1  ;;  %v732_v5 = vld [vmem:[#allocation5 + $0x54] ss:$8 sps:$4 sm:$0xff]   ;;  %v734_v6 = vld [vmem:[#allocation5 + $0x50] ss:$8 sps:$4 sm:$0xff]   ;;  %v735_v7 = vld [vmem:[#allocation5 + $0x44] ss:$8 sps:$4 sm:$0xff]  }
  0x4c   : > { %348 = vmatpush1.bf16.msra.mxu0 %v728_v2  ;;  %654 = vmatpush1.bf16.msra.mxu1 %v728_v2  ;;  %v737_v8 = vld [vmem:[#allocation5 + $0x40] ss:$8 sps:$4 sm:$0xff]   ;;  %v738_v9 = vld [vmem:[#allocation5 + $0x34] ss:$8 sps:$4 sm:$0xff]   ;;  %v740_v10 = vld [vmem:[#allocation5 + $0x30] ss:$8 sps:$4 sm:$0xff]  }
  0x4d   : > { %349 = vmatprep.subr.bf16.mxu0 %v729_v3  ;;  %647 = vmatprep.subr.bf16.mxu1 %v729_v3  ;;  %v741_v11 = vld [vmem:[#allocation5 + $0x24] ss:$8 sps:$4 sm:$0xff]   ;;  %v743_v12 = vld [vmem:[#allocation5 + $0x20] ss:$8 sps:$4 sm:$0xff]   ;;  %v744_v13 = vld [vmem:[#allocation5 + $0x14] ss:$8 sps:$4 sm:$0xff]  }
  0x4e   : > { %v746_v14 = vld [vmem:[#allocation5 + $0x10] ss:$8 sps:$4 sm:$0xff]   ;;  %v747_v15 = vld [vmem:[#allocation5 + $0x4] ss:$8 sps:$4 sm:$0xff]   ;;  %v749_v16 = vld [vmem:[#allocation5] ss:$8 sps:$4 sm:$0xff]  }
  0x4f   : > { %v751_v18 = vld [vmem:[%s1028_s29 + $0x10] sm:$0xff]   ;;  %v752_v19 = vld [vmem:[%s1028_s29 + $0x8] sm:$0xff]   ;;  %v753_v20 = vld [vmem:[%s1028_s29 + $0x18] sm:$0xff]   ;;  %v234_v22 = vshrl.u32 %v233_v21, 7  ;;  %s600_s17 = sshll.u32 %s1024_s26, 6  ;;  %s645_s25 = sshll.u32 %s929_s16, 10 }
  0x50   : > { %350 = vmatpush1.bf16.msra.mxu0 %v731_v4  ;;  %655 = vmatpush1.bf16.msra.mxu1 %v731_v4  ;;  %v231_v24 = vld [vmem:[%s1108_s2] sm:$0x3]  ;;  %s1046_s22 = scalar_lea.vmem [#allocation7], %s600_s17  ;;  %s1061_s7 = scalar_lea.hbm %s1109_s3, %s645_s25 }
  0x51   : > { %351 = vmatprep.subr.bf16.mxu0 %v732_v5  ;;  %648 = vmatprep.subr.bf16.mxu1 %v732_v5  ;;  %v235_v23 = vsub.s32 0, %v234_v22  ;;  %v239_v25 = vsub.s32 1, %v234_v22  ;;  %s507_s23 = sshll.u32 %s1046_s22, 4  ;;  %s493_s16 = scalar_lea.sflag [#allocation4], %s1024_s26  ;;  %s1056_s23 = int_to_ptr.vmem [resolvable:$true] %s507_s23 }
  0x52   : > { %s808_s8 = scalar_lea.vmem %s1056_s23, 1024  ;;  %p1125_p11 = scmp.ne.s32.totalorder %s1119_s6, 0 }
  0x53   : > { %v236_v26 = vrot.slane %v231_v24, %v235_v23  ;;  %v240_v27 = vrot.slane %v231_v24, %v239_v25  ;;  %p809_p3 = scmp.ne.s32.totalorder %s1056_s23, %s808_s8  ;;  %s885_s9 = smov [#allocation7]  }
  0x54   : > { %352 = vmatpush1.bf16.msra.mxu0 %v734_v6  ;;  %656 = vmatpush1.bf16.msra.mxu1 %v734_v6  ;;  %s812_s10 = sshll.u32 %s885_s9, 4  ;;  %s813_s10 = int_to_ptr.vmem [resolvable:$false] %s812_s10 }
  0x55   : > { %353 = vmatprep.subr.bf16.mxu0 %v735_v7  ;;  %649 = vmatprep.subr.bf16.mxu1 %v735_v7  ;;  %p810_p7 = pnand %p809_p3, %p1125_p11  ;;  %s814_s11 = scalar_lea.vmem %s813_s10, 2048 }
  0x56   : > { %p815_p10 = scmp.lt.s32.totalorder %s1056_s23, %s813_s10  ;;  %p816_p2 = scmp.lt.s32.totalorder %s814_s11, %s808_s8 }
  0x57   : > { %p811_p12 = pneg %p810_p7 }
  0x58   : > { %354 = vmatpush1.bf16.msra.mxu0 %v737_v8  ;;  %657 = vmatpush1.bf16.msra.mxu1 %v737_v8  ;;  %p817_p13 = por %p816_p2, %p815_p10 }
  0x59   : > { %355 = vmatprep.subr.bf16.mxu0 %v738_v9  ;;  %650 = vmatprep.subr.bf16.mxu1 %v738_v9 }
  0x5a   : > { %p818_p0 = pnand %p817_p13, %p811_p12 }
  0x5c   : > { %356 = vmatpush1.bf16.msra.mxu0 %v740_v10  ;;  %658 = vmatpush1.bf16.msra.mxu1 %v740_v10 }
  0x5d   : > { %357 = vmatprep.subr.bf16.mxu0 %v741_v11  ;;  %651 = vmatprep.subr.bf16.mxu1 %v741_v11 }
  0x60   : > { %358 = vmatpush1.bf16.msra.mxu0 %v743_v12  ;;  %659 = vmatpush1.bf16.msra.mxu1 %v743_v12 }
  0x61   : > { %359 = vmatprep.subr.bf16.mxu0 %v744_v13  ;;  %652 = vmatprep.subr.bf16.mxu1 %v744_v13 }
  0x64   : > { %360 = vmatpush1.bf16.msra.mxu0 %v746_v14  ;;  %660 = vmatpush1.bf16.msra.mxu1 %v746_v14 }
  0x65   : > { %361 = vmatprep.subr.bf16.mxu0 %v747_v15  ;;  %653 = vmatprep.subr.bf16.mxu1 %v747_v15 }
  0x68   : > { %362 = vmatpush1.bf16.msra.mxu0 %v749_v16  ;;  %661 = vmatpush1.bf16.msra.mxu1 %v749_v16 }
  0x6b   : > { %380 = vmatmul.mubr.bf16.vlgmr.msra.gmra.mxu0 %v750_v17  ;;  %400 = vmatmul.mubr.bf16.vlgmr.msra.gmra.mxu1 %v751_v18 }
  0x6c   : > { %389 = vmatprep.mubr.bf16.mxu0 %v884_v0  ;;  %409 = vmatprep.mubr.bf16.mxu1 %v884_v0 }
  0x73   : > { %390 = vmatmul.mubr.bf16.gmra.mxu0 %v752_v19  ;;  %410 = vmatmul.mubr.bf16.gmra.mxu1 %v753_v20 }
 0x12b   : > { %v381_v28 = vpop.f32.mrf.mxu0  ;;  %v401_v29 = vpop.f32.mrf.mxu1 }
 0x12c   : > { %v382_v30 = vadd.f32 %v381_v28, %v236_v26  ;;  %v402_v31 = vadd.f32 %v401_v29, %v236_v26 }
 0x12d   : > { %v383_v32 = vpop.f32.mrf.mxu0  ;;  %v403_v33 = vpop.f32.mrf.mxu1 }
 0x12e   : > { %v384_v34 = vadd.f32 %v383_v32, %v240_v27  ;;  %v404_v35 = vadd.f32 %v403_v33, %v240_v27  ;;  %v420_v38 = vmax.f32 %v382_v30, 0.0  ;;  %v428_v39 = vmax.f32 %v402_v31, 0.0 }
 0x12f   : > { %v385_v36 = vpop.f32.mrf.mxu0  ;;  %v405_v37 = vpop.f32.mrf.mxu1 }
 0x130   : > { %v421_v40 = vmax.f32 %v384_v34, 0.0  ;;  %v429_v41 = vmax.f32 %v404_v35, 0.0  ;;  %v386_v42 = vadd.f32 %v385_v36, %v236_v26  ;;  %v406_v43 = vadd.f32 %v405_v37, %v236_v26 }
 0x131   : > { %v387_v44 = vpop.f32.mrf.mxu0  ;;  %v407_v45 = vpop.f32.mrf.mxu1 }
 0x132   : > { %v636_v46 = vpack.c.bf16 %v421_v40, %v420_v38  ;;  %v640_v47 = vpack.c.bf16 %v429_v41, %v428_v39  ;;  %v388_v48 = vadd.f32 %v387_v44, %v240_v27  ;;  %v408_v49 = vadd.f32 %v407_v45, %v240_v27 }
 0x133   : > { %v391_v50 = vpop.f32.mrf.mxu0  ;;  %v411_v51 = vpop.f32.mrf.mxu1  ;;  %v422_v54 = vmax.f32 %v386_v42, 0.0  ;;  %v430_v55 = vmax.f32 %v406_v43, 0.0 }
 0x134   : > { %484 = vst [vmem:[%s1046_s22] sm:$0xff] %v636_v46  ;;  %488 = vst [vmem:[%s1046_s22 + $0x20] sm:$0xff] %v640_v47  ;;  %v392_v52 = vadd.f32 %v391_v50, %v236_v26  ;;  %v412_v53 = vadd.f32 %v411_v51, %v236_v26  ;;  %v423_v56 = vmax.f32 %v388_v48, 0.0  ;;  %v431_v57 = vmax.f32 %v408_v49, 0.0 }
 0x135   : > { %v393_v58 = vpop.f32.mrf.mxu0  ;;  %v413_v59 = vpop.f32.mrf.mxu1 }
 0x136   : > { %v394_v60 = vadd.f32 %v393_v58, %v240_v27  ;;  %v414_v61 = vadd.f32 %v413_v59, %v240_v27  ;;  %v637_v62 = vpack.c.bf16 %v423_v56, %v422_v54  ;;  %v641_v63 = vpack.c.bf16 %v431_v57, %v430_v55 }
 0x137   : > { %v395_v0 = vpop.f32.mrf.mxu0  ;;  %v415_v1 = vpop.f32.mrf.mxu1  ;;  %v424_v2 = vmax.f32 %v392_v52, 0.0  ;;  %v432_v3 = vmax.f32 %v412_v53, 0.0 }
 0x138   : > { %v425_v4 = vmax.f32 %v394_v60, 0.0  ;;  %v433_v5 = vmax.f32 %v414_v61, 0.0  ;;  %485 = vst [vmem:[%s1046_s22 + $0x8] sm:$0xff] %v637_v62  ;;  %489 = vst [vmem:[%s1046_s22 + $0x28] sm:$0xff] %v641_v63  ;;  %v396_v6 = vadd.f32 %v395_v0, %v236_v26  ;;  %v416_v7 = vadd.f32 %v415_v1, %v236_v26 }
 0x139   : > { %v397_v8 = vpop.f32.mrf.mxu0  ;;  %v417_v9 = vpop.f32.mrf.mxu1 }
 0x13a   : > { %v638_v10 = vpack.c.bf16 %v425_v4, %v424_v2  ;;  %v642_v11 = vpack.c.bf16 %v433_v5, %v432_v3  ;;  %v398_v12 = vadd.f32 %v397_v8, %v240_v27  ;;  %v418_v13 = vadd.f32 %v417_v9, %v240_v27 }
 0x13b   : > { %v426_v14 = vmax.f32 %v396_v6, 0.0  ;;  %v434_v15 = vmax.f32 %v416_v7, 0.0 }
 0x13c   : > { %486 = vst [vmem:[%s1046_s22 + $0x10] sm:$0xff] %v638_v10  ;;  %490 = vst [vmem:[%s1046_s22 + $0x30] sm:$0xff] %v642_v11  ;;  %v427_v16 = vmax.f32 %v398_v12, 0.0  ;;  %v435_v17 = vmax.f32 %v418_v13, 0.0 }
 0x13e   : > { %v639_v18 = vpack.c.bf16 %v427_v16, %v426_v14  ;;  %v643_v19 = vpack.c.bf16 %v435_v17, %v434_v15 }
 0x140   : > { %487 = vst [vmem:[%s1046_s22 + $0x18] sm:$0xff] %v639_v18  ;;  %491 = vst [vmem:[%s1046_s22 + $0x38] sm:$0xff] %v643_v19 }
 0x141   : > { %821 = shalt.err (!%p818_p0)
}
 0x142   : > { %s822_s21 = scalar_lea.hbm %s1061_s7, 1024  ;;  %s826_s29 = scalar_lea.hbm %s1109_s3, 2048 }
 0x143   : > { %p823_p5 = scmp.ne.s32.totalorder %s1061_s7, %s822_s21  ;;  %p827_p4 = scmp.lt.s32.totalorder %s1061_s7, %s1109_s3 }
 0x144   : > { %p828_p6 = scmp.lt.s32.totalorder %s826_s29, %s822_s21 }
 0x145   : > { %p824_p9 = pnand %p823_p5, %p1125_p11 }
 0x146   : > { %p829_p8 = por %p828_p6, %p827_p4 }
 0x147   : > { %p825_p1 = pneg %p824_p9 }
 0x149   : > { %p830_p3 = pnand %p829_p8, %p825_p1 }
 0x14b   : > { %833 = shalt.err (!%p830_p3)
}
 0x14c   : > { %s886_s17 = smov 128   ;;  %s887_s22 = smov 8  }
 0x14d   : > { %668 = dma.vmem_to_hbm [thread:$0]  (%p1125_p11), %s1056_s23, 1024, %s1061_s7, %s493_s16, %s886_s17, %s886_s17, %s887_s22  }
 0x14e PF: > { %s522_s25 = sand.u32 1, %s864_s12   ;;  %p1126_p7 = scmp.ne.s32.totalorder %s1115_s19, 0 }
 0x14f   : > { %p1127_p12 = scmp.ge.s32.totalorder %s876_s15, 2  ;;  %s523_s30 = scalar_lea.sflag [#allocation4], %s522_s25 }
 0x151   : > { %p679_p10 = pnand %p1127_p12, %p1126_p7 }
 0x153   : > { %p680_p2 = pneg %p679_p10 }
 0x155   : > { %859 = dma.done.wait (%p680_p2), %s523_s30, 1024  }
 0x156   : > { %861 = vsyncadd (%p680_p2), %s523_s30, 4294966272  ;;  %p17_p13 = scmp.ge.s32.totalorder %s962_s24, 4   ;;  %s1128_s12 = smov %s868_s13 }
 0x157   : > { %s1129_s13 = smov %s872_s14  ;;  %s1130_s14 = smov %s979_s5 }
 0x158   : > { %s1131_s15 = smov %s962_s24  ;;  %19 = sbr.rel (!%p17_p13) target bundleno = 6 (0x6), region = 81 }
 0x15d   :  { %528 = vsyncpa [#allocation3], 1 }
 0x15e   :  { %530 = vsyncpa [#allocation3 + $0x1], 1 }
 0x15f   :  { %531 = vsyncpa [#allocation6], 1 }
 0x160   :  { %532 = vsyncpa [#allocation4], 1 }
 0x161   :  { %534 = vsyncpa [#allocation4 + $0x1], 1 }

</bundles_post_ra>
